<compile_context>
chip_gen: v5e
topology: v5e:2x2
jax: 0.10.0
libtpu: 0.0.40
codegen_flags: <defaults>
</compile_context>

<pallas_src>
import math
import numpy as np
import jax
import jax.numpy as jnp
from jax.experimental import pallas as pl
from jax.experimental.pallas import tpu as pltpu


# ---------------------------------------------------------------------------
# ada_hermite: deterministic builder of the Hermite function system
# Phi(params), params = (dilation, translation).  The forward pass of vpfun
# only needs Phi (dPhi / ind are used only in the custom backward).
# ---------------------------------------------------------------------------
def ada_hermite(m, n, params, dtype=jnp.float32):
    dilation = params[0]
    translation = params[1]
    t = jnp.arange(m, dtype=dtype)
    x = dilation * (t - (m - 1) / 2.0 - translation)
    w = jnp.exp(-0.5 * x * x)
    hs = []
    for k in range(n):
        if k == 0:
            h = jnp.ones_like(x)
        elif k == 1:
            h = 2.0 * x
        else:
            h = 2.0 * x * hs[k - 1] - 2.0 * (k - 1) * hs[k - 2]
        hs.append(h)
    cols = []
    for k in range(n):
        norm = 1.0 / math.sqrt((2.0 ** k) * math.factorial(k) * math.sqrt(math.pi))
        cols.append(norm * hs[k] * w)
    phi = jnp.stack(cols, axis=1) * jnp.sqrt(jnp.abs(dilation))  # (m, n)
    return phi


# ---------------------------------------------------------------------------
# Pallas kernel: one MXU matmul per M-tile.
#   x_ref: (tm, L)          bf16 (or f32) signal rows
#   w_ref: (L, n_out*td)    folded projection-times-attenuation matrix
#   o_ref: (tm, n_out*td)   f32 output tile
# ---------------------------------------------------------------------------
def tdvp_kernel(x_ref, w_ref, o_ref):
    o_ref[...] = jnp.dot(
        x_ref[...], w_ref[...], preferred_element_type=jnp.float32
    ).astype(o_ref.dtype)


def temporal_tdvp_forward(x, weight, n_out, td,
                          compute_dtype=jnp.bfloat16, block_m=512):
    """Forward pass of temporal_tdvp_layer.

    x:      (N, C, L) float32   (L == n_in)
    weight: (2,)      float32   [dilation, translation]
    returns (N, C, n_out, td) float32
    """
    N, C, L = x.shape
    M = N * C
    KTD = n_out * td

    # --- tiny parameter prep in plain JAX (no MXU benefit) -----------------
    phi = ada_hermite(L, n_out, weight, dtype=jnp.float32)      # (L, n_out)
    phip = jnp.linalg.pinv(phi)                                 # (n_out, L)
    atten = jnp.linspace(0.25, 1.0, td, dtype=jnp.float32)      # (td,)
    # Fold attenuation into the projection matrix:
    #   W[l, k*td + t] = phip[k, l] * atten[t]
    W = (phip.T[:, :, None] * atten[None, None, :]).reshape(L, KTD)

    xr = x.reshape(M, L).astype(compute_dtype)
    Wc = W.astype(compute_dtype)

    # --- M-tiling: big tiles amortize the ~0.35 us per-grid-step overhead.
    # (tm, L) and (tm, KTD) tiles at tm<=512 are well under the scoped VMEM
    # limit on v5e/v6e and also on v7x's smaller 64 MiB VMEM.
    tm = M if M <= block_m else block_m          # tm multiple of 8 or == M
    grid = (pl.cdiv(M, tm),)

    in_bytes = (M * L + L * KTD) * jnp.dtype(compute_dtype).itemsize
    out_bytes = M * KTD * 4

    out = pl.pallas_call(
        tdvp_kernel,
        out_shape=jax.ShapeDtypeStruct((M, KTD), jnp.float32),
        grid=grid,
        in_specs=[
            pl.BlockSpec((tm, L), lambda i: (i, 0)),
            pl.BlockSpec((L, KTD), lambda i: (0, 0)),   # stays VMEM-resident
        ],
        out_specs=pl.BlockSpec((tm, KTD), lambda i: (i, 0)),
        compiler_params=pltpu.CompilerParams(
            dimension_semantics=("parallel",),
        ),
        cost_estimate=pl.CostEstimate(
            flops=2 * M * L * KTD,
            transcendentals=0,
            bytes_accessed=in_bytes + out_bytes,
        ),
    )(xr, Wc)

    # (M, n_out*td) -> (N, C, n_out, td) is a pure row-major reshape (free).
    return out.reshape(N, C, n_out, td)


if __name__ == "__main__":
    # Small shapes consistent with the module: batch=2, channels=4,
    # n_in=16 (signal length), n_out=8 (Hermite functions), td=4.
    N, C, n_in, n_out, td = 2, 4, 16, 8, 4

    key = jax.random.PRNGKey(0)
    x = jax.random.normal(key, (N, C, n_in), dtype=jnp.float32)
    weight = jnp.array([0.1, 0.0], dtype=jnp.float32)   # layer default init

    out = temporal_tdvp_forward(x, weight, n_out, td)
    out = jax.block_until_ready(out)
    assert out.shape == (N, C, n_out, td)

    # Pure-JAX reference of the same forward semantics, using the same
    # bf16-rounded operands the kernel consumes (the bf16 cast is the only
    # intentional numerical difference vs. the f32 PyTorch module).
    phi = ada_hermite(n_in, n_out, weight, dtype=jnp.float32)
    phip = jnp.linalg.pinv(phi)
    atten = jnp.linspace(0.25, 1.0, td, dtype=jnp.float32)
    W = (phip.T[:, :, None] * atten[None, None, :]).reshape(n_in, n_out * td)
    xr_bf = x.reshape(N * C, n_in).astype(jnp.bfloat16).astype(jnp.float32)
    W_bf = W.astype(jnp.bfloat16).astype(jnp.float32)
    ref = (xr_bf @ W_bf).reshape(N, C, n_out, td)

    np.testing.assert_allclose(np.asarray(out), np.asarray(ref),
                               rtol=1e-3, atol=1e-3)
    print("KERNEL_OK")

    # TODO(synk): vpfun.backward (custom gradient w.r.t. dilation/translation
    # and the penalty regularization term) is training-only and not implemented.
</pallas_src>

<mosaic_0001>
module attributes {stable_mosaic.version = 11 : i64} {
  func.func @tdvp_kernel(%arg0: i32, %arg1: memref<8x16xbf16, #tpu.memory_space<vmem>>, %arg2: memref<16x32xbf16, #tpu.memory_space<vmem>>, %arg3: memref<8x32xf32, #tpu.memory_space<vmem>>) attributes {dimension_semantics = [#tpu.dimension_semantics<parallel>], iteration_bounds = array<i64: 1>, scalar_prefetch = 0 : i64, scratch_operands = 0 : i64, tpu.core_type = #tpu.core_type<tc>, window_params = [{transform_indices = @transform_0, window_bounds = array<i64: 8, 16>}, {pipeline_mode = #tpu.pipeline_mode<synchronous>, transform_indices = @transform_1, window_bounds = array<i64: 16, 32>}, {transform_indices = @transform_2, window_bounds = array<i64: 8, 32>}]} {
    %c0 = arith.constant 0 : index
    %c0_0 = arith.constant 0 : index
    %0 = vector.load %arg1[%c0, %c0_0] : memref<8x16xbf16, #tpu.memory_space<vmem>>, vector<8x16xbf16>
    %c0_1 = arith.constant 0 : index
    %c0_2 = arith.constant 0 : index
    %1 = vector.load %arg2[%c0_1, %c0_2] : memref<16x32xbf16, #tpu.memory_space<vmem>>, vector<16x32xbf16>
    %cst = arith.constant dense<0.000000e+00> : vector<8x32xf32>
    %2 = tpu.matmul %0, %1, %cst {dimension_numbers = #tpu.dot_dimension_numbers<[1], [0], [0], [1], [0, 0, 1, 1], [], []>} : vector<8x16xbf16>, vector<16x32xbf16>, vector<8x32xf32> -> vector<8x32xf32>
    %c0_3 = arith.constant 0 : index
    %c0_4 = arith.constant 0 : index
    %3 = vector.load %arg3[%c0_3, %c0_4] : memref<8x32xf32, #tpu.memory_space<vmem>>, vector<8x32xf32>
    tpu.vector_store %arg3[%c0_3, %c0_4], %2 {strides = array<i32>} : memref<8x32xf32, #tpu.memory_space<vmem>>, vector<8x32xf32>,
    return
  }
  func.func @transform_0(%arg0: i32) -> (i32, i32) {
    %c0_i32 = arith.constant 0 : i32
    %c0_i32_0 = arith.constant 0 : i32
    return %arg0, %c0_i32 : i32, i32
  }
  func.func @transform_1(%arg0: i32) -> (i32, i32) {
    %c0_i32 = arith.constant 0 : i32
    %c0_i32_0 = arith.constant 0 : i32
    %c0_i32_1 = arith.constant 0 : i32
    return %c0_i32, %c0_i32_0 : i32, i32
  }
  func.func @transform_2(%arg0: i32) -> (i32, i32) {
    %c0_i32 = arith.constant 0 : i32
    %c0_i32_0 = arith.constant 0 : i32
    return %arg0, %c0_i32 : i32, i32
  }
}

</mosaic_0001>

<bundles_post_ra>
// kernel: tpu_custom_call.1
= control target key start
LH: loop header
LB: loop body
LE: loop exit
PB: predicated region body
PF: predicated region fallthrough
CT: control target
= control target key end

     0   :  { %7 = vsyncpa [#allocation3], 0  ;;  %s207_s0 = inlined_call_operand.hbm [shape: bf16[8,16], index: 0, kind: input, shape index: {}]   ;;  %s208_s1 = inlined_call_operand.hbm [shape: bf16[16,32], index: 1, kind: input, shape index: {}]   ;;  %s209_s2 = inlined_call_operand.hbm [shape: f32[8,32], index: 2, kind: output, shape index: {}]  }
   0x1   :  { %8 = vsyncpa [#allocation6], 0 }
   0x2   :  { %9 = vsyncpa [#allocation4], 0  ;;  %s15_s11 = sshll.u32 %s207_s0, 4  ;;  %s178_s12 = smov [#allocation2]   ;;  %s16_s11 = int_to_ptr.hbm [resolvable:$true] %s15_s11 }
   0x3   :  { %s17_s13 = sshll.u32 %s178_s12, 4  ;;  %s25_s16 = sshll.u32 %s208_s1, 4  ;;  %s18_s13 = int_to_ptr.vmem [resolvable:$true] %s17_s13  ;;  %s26_s16 = int_to_ptr.hbm [resolvable:$true] %s25_s16 }
   0x4   :  { %20 = dma.hbm_to_vmem [thread:$0]  %s16_s11, 64, %s18_s13, [#allocation3]  }
   0x5   :  { %s179_s17 = smov [#allocation5]   ;;  %s180_s19 = smov 64  }
   0x6   :  { %s27_s18 = sshll.u32 %s179_s17, 4  ;;  %s181_s20 = smov 4   ;;  %s28_s18 = int_to_ptr.vmem [resolvable:$true] %s27_s18 }
   0x7   :  { %33 = dma.hbm_to_vmem [thread:$0]  %s26_s16, 128, %s28_s18, [#allocation6], %s180_s19, %s180_s19, %s181_s20  }
   0x8   :  { %172 = dma.done.wait [#allocation3], 64  }
   0x9   :  { %173 = vsyncadd [#allocation3], 4294967232 }
   0xa   :  { %174 = dma.done.wait [#allocation6], 128  }
   0xb   :  { %175 = vsyncadd [#allocation6], 4294967168  ;;  %v94_v0 = vld [vmem:[#allocation5] sm:$0xff]  ;;  %v43_v1 = vld [vmem:[#allocation2] sm:$0xf]  ;;  %vm52_vm0 = vcmask 130048  }
   0xc   :  { %63 = vmatpush.bf16.msra.mxu0 %v94_v0  ;;  %s182_s0 = smov [#allocation7]   ;;  %s78_s23 = sshll.u32 %s209_s2, 4  ;;  %vm69_vm1 = vcmask 261120   ;;  %s79_s23 = int_to_ptr.hbm [resolvable:$true] %s78_s23 }
   0xd   :  { %s76_s21 = sshll.u32 %s182_s0, 4  ;;  %s77_s21 = int_to_ptr.vmem [resolvable:$true] %s76_s21 }
   0xf   :  { %93 = vmatmul.msk.bf16.vlgmr.msra.gmra.mxu0 %vm52_vm0, %v43_v1 }
  0x8c   :  { %v65_v2 = vpop.f32.mrf.mxu0 }
  0x8d   :  { %70 = vst.msk [vmem:[#allocation7] sm:$0xff] %vm69_vm1, %v65_v2 }
  0x8e   :  { %81 = dma.vmem_to_hbm [thread:$0]  %s77_s21, 128, %s79_s23, [#allocation4]  }
  0x94   :  { %v67_v3 = vpop.f32.mrf.mxu0 }
  0x95   :  { %176 = dma.done.wait [#allocation4], 128  }
  0x96   :  { %177 = vsyncadd [#allocation4], 4294967168 }
  0x97   :  { %86 = vsyncpa [#allocation3], 1 }
  0x98   :  { %87 = vsyncpa [#allocation6], 1 }
  0x99   :  { %88 = vsyncpa [#allocation4], 1 }

</bundles_post_ra>
